<compile_context>
chip_gen: v7x
topology: tpu7x:2x2x1
jax: 0.10.0
libtpu: 0.0.40
codegen_flags: <defaults>
</compile_context>

<pallas_src>
import functools

import jax
import jax.numpy as jnp
from jax import lax
from jax.experimental import pallas as pl
from jax.experimental.pallas import tpu as pltpu


def _linear_vnet_kernel(x_ref, w1_ref, b1_ref, w2_ref, b2_ref, o_ref):
    # x_ref : (tb, in)        native layout; contiguous HBM DMA per tile
    # w1_ref: (hidden, in)    resident in VMEM across the grid
    # b1_ref: (hidden, 1)
    # w2_ref: (out, hidden)
    # b2_ref: (out, 1)
    # o_ref : (out, tb)       lane-dense (batch on lanes) -> unmasked stores

    # linear1 + ReLU: contract both last dims so the 16-row x tile is
    # transposed on-chip; MXU matmul with f32 accumulation.
    h = lax.dot_general(
        w1_ref[...], x_ref[...],
        dimension_numbers=(((1,), (1,)), ((), ())),
        preferred_element_type=jnp.float32)                 # (hidden, tb)
    h = jnp.maximum(h + b1_ref[...], 0.0)

    # linear2: keep the f32 accumulator between the two matmuls.
    y = jnp.dot(w2_ref[...], h,
                preferred_element_type=jnp.float32)         # (out, tb)
    y = y + b2_ref[...]
    o_ref[...] = y.astype(o_ref.dtype)


@functools.partial(jax.jit, static_argnames=("batch_tile",))
def linear_vnet_forward(x, w1, b1, w2, b2, *, batch_tile=16384):
    """Forward pass of Linear_VNet.

    x:  (B, in_size)
    w1: (hidden, in_size)   -- PyTorch nn.Linear layout (out_features, in_features)
    b1: (hidden,)
    w2: (out_size, hidden)
    b2: (out_size,)
    returns (B, out_size)
    """
    B, in_size = x.shape
    hidden = w1.shape[0]
    out_size = w2.shape[0]
    dtype = x.dtype

    # Tiny weights: cast to the activation dtype and reshape biases to
    # broadcastable columns (metadata-only ops on KiB-sized arrays).
    w1 = w1.astype(dtype)
    w2 = w2.astype(dtype)
    b1c = b1.astype(dtype).reshape(hidden, 1)
    b2c = b2.astype(dtype).reshape(out_size, 1)

    # Lane-aligned batch tile (validated multiple of 128).  Ragged tails and
    # batches smaller than one tile are masked by Pallas at the block
    # boundary -- no wrapper-side padding / copies of x.
    bt = 128 * pl.cdiv(max(int(batch_tile), 128), 128)
    tb = min(bt, 128 * pl.cdiv(B, 128))
    grid = (pl.cdiv(B, tb),)
    # NOTE(v7x): with dimension_semantics=("parallel",) the grid is split
    # across the two TensorCores; for very large B prefer a batch_tile that
    # gives an even number of grid steps so both cores get balanced work.

    itemsize = jnp.dtype(dtype).itemsize
    cost = pl.CostEstimate(
        flops=2 * B * (in_size * hidden + hidden * out_size),
        transcendentals=0,
        bytes_accessed=(B * (in_size + out_size)
                        + hidden * (in_size + 1)
                        + out_size * (hidden + 1)) * itemsize)

    yt = pl.pallas_call(
        _linear_vnet_kernel,
        out_shape=jax.ShapeDtypeStruct((out_size, B), dtype),
        grid=grid,
        in_specs=[
            pl.BlockSpec((tb, in_size), lambda i: (i, 0)),       # streamed x tiles
            pl.BlockSpec((hidden, in_size), lambda i: (0, 0)),   # resident W1
            pl.BlockSpec((hidden, 1), lambda i: (0, 0)),         # resident b1
            pl.BlockSpec((out_size, hidden), lambda i: (0, 0)),  # resident W2
            pl.BlockSpec((out_size, 1), lambda i: (0, 0)),       # resident b2
        ],
        out_specs=pl.BlockSpec((out_size, tb), lambda i: (0, i)),
        compiler_params=pltpu.CompilerParams(
            dimension_semantics=("parallel",)),                  # 2 TCs on v7x
        cost_estimate=cost,
    )(x, w1, b1c, w2, b2c)

    # Single small post-processing transpose of y only (out=8 columns);
    # x never makes an extra HBM round trip.
    return yt.T                                                  # (B, out_size)


def init_params(key, input_size, hidden_size, output_size, dtype=jnp.float32):
    """Deterministic init matching nn.Linear shapes (native PyTorch layout)."""
    k1, k2, k3, k4 = jax.random.split(key, 4)
    bound1 = 1.0 / (input_size ** 0.5)
    bound2 = 1.0 / (hidden_size ** 0.5)
    w1 = jax.random.uniform(k1, (hidden_size, input_size), dtype, -bound1, bound1)
    b1 = jax.random.uniform(k2, (hidden_size,), dtype, -bound1, bound1)
    w2 = jax.random.uniform(k3, (output_size, hidden_size), dtype, -bound2, bound2)
    b2 = jax.random.uniform(k4, (output_size,), dtype, -bound2, bound2)
    return w1, b1, w2, b2


if __name__ == "__main__":
    input_size, hidden_size, output_size = 16, 32, 8

    key = jax.random.PRNGKey(0)
    kx, kx2, kp = jax.random.split(key, 3)
    w1, b1, w2, b2 = init_params(kp, input_size, hidden_size, output_size)

    def ref_fn(x):
        return jnp.maximum(x @ w1.T + b1, 0.0) @ w2.T + b2

    # Small batch (single grid step; block padded past B, masked on write).
    x_small = jax.random.normal(kx, (8, input_size), jnp.float32)
    out_small = jax.block_until_ready(linear_vnet_forward(x_small, w1, b1, w2, b2))
    assert out_small.shape == (8, output_size)
    assert jnp.allclose(out_small, ref_fn(x_small), atol=1e-5, rtol=1e-5)

    # Larger ragged batch to exercise grid > 1 and the boundary-masking path.
    x_big = jax.random.normal(kx2, (300, input_size), jnp.float32)
    out_big = jax.block_until_ready(
        linear_vnet_forward(x_big, w1, b1, w2, b2, batch_tile=128))
    assert out_big.shape == (300, output_size)
    assert jnp.allclose(out_big, ref_fn(x_big), atol=1e-5, rtol=1e-5)

    print("KERNEL_OK")
</pallas_src>

<mosaic_0001>
module attributes {stable_mosaic.version = 11 : i64} {
  func.func @_linear_vnet_kernel(%arg0: i32, %arg1: memref<128x16xf32, #tpu.memory_space<vmem>>, %arg2: memref<32x16xf32, #tpu.memory_space<vmem>>, %arg3: memref<32x1xf32, #tpu.memory_space<vmem>>, %arg4: memref<8x32xf32, #tpu.memory_space<vmem>>, %arg5: memref<8x1xf32, #tpu.memory_space<vmem>>, %arg6: memref<8x128xf32, #tpu.memory_space<vmem>>) attributes {dimension_semantics = [#tpu.dimension_semantics<parallel>], iteration_bounds = array<i64: 1>, scalar_prefetch = 0 : i64, scratch_operands = 0 : i64, tpu.core_type = #tpu.core_type<tc>, window_params = [{transform_indices = @transform_0, window_bounds = array<i64: 128, 16>}, {pipeline_mode = #tpu.pipeline_mode<synchronous>, transform_indices = @transform_1, window_bounds = array<i64: 32, 16>}, {pipeline_mode = #tpu.pipeline_mode<synchronous>, transform_indices = @transform_2, window_bounds = array<i64: 32, 1>}, {pipeline_mode = #tpu.pipeline_mode<synchronous>, transform_indices = @transform_3, window_bounds = array<i64: 8, 32>}, {pipeline_mode = #tpu.pipeline_mode<synchronous>, transform_indices = @transform_4, window_bounds = array<i64: 8, 1>}, {transform_indices = @transform_5, window_bounds = array<i64: 8, 128>}]} {
    %c0 = arith.constant 0 : index
    %c0_0 = arith.constant 0 : index
    %0 = vector.load %arg2[%c0, %c0_0] : memref<32x16xf32, #tpu.memory_space<vmem>>, vector<32x16xf32>
    %c0_1 = arith.constant 0 : index
    %c0_2 = arith.constant 0 : index
    %1 = vector.load %arg1[%c0_1, %c0_2] : memref<128x16xf32, #tpu.memory_space<vmem>>, vector<128x16xf32>
    %cst = arith.constant dense<0.000000e+00> : vector<32x128xf32>
    %2 = tpu.matmul %0, %1, %cst {dimension_numbers = #tpu.dot_dimension_numbers<[1], [1], [0], [0], [0, 0, 1, 0], [], []>} : vector<32x16xf32>, vector<128x16xf32>, vector<32x128xf32> -> vector<32x128xf32>
    %c0_3 = arith.constant 0 : index
    %c0_4 = arith.constant 0 : index
    %3 = vector.load %arg3[%c0_3, %c0_4] : memref<32x1xf32, #tpu.memory_space<vmem>>, vector<32x1xf32>
    %4 = vector.broadcast %3 : vector<32x1xf32> to vector<32x128xf32>
    %5 = arith.addf %2, %4 : vector<32x128xf32>
    %cst_5 = arith.constant 0.000000e+00 : f32
    %6 = vector.broadcast %cst_5 : f32 to vector<32x128xf32>
    %7 = arith.maximumf %5, %6 : vector<32x128xf32>
    %c0_6 = arith.constant 0 : index
    %c0_7 = arith.constant 0 : index
    %8 = vector.load %arg4[%c0_6, %c0_7] : memref<8x32xf32, #tpu.memory_space<vmem>>, vector<8x32xf32>
    %cst_8 = arith.constant dense<0.000000e+00> : vector<8x128xf32>
    %9 = tpu.matmul %8, %7, %cst_8 {dimension_numbers = #tpu.dot_dimension_numbers<[1], [0], [0], [1], [0, 0, 1, 1], [], []>} : vector<8x32xf32>, vector<32x128xf32>, vector<8x128xf32> -> vector<8x128xf32>
    %c0_9 = arith.constant 0 : index
    %c0_10 = arith.constant 0 : index
    %10 = vector.load %arg5[%c0_9, %c0_10] : memref<8x1xf32, #tpu.memory_space<vmem>>, vector<8x1xf32>
    %11 = vector.broadcast %10 : vector<8x1xf32> to vector<8x128xf32>
    %12 = arith.addf %9, %11 : vector<8x128xf32>
    %c0_11 = arith.constant 0 : index
    %c0_12 = arith.constant 0 : index
    %13 = vector.load %arg6[%c0_11, %c0_12] : memref<8x128xf32, #tpu.memory_space<vmem>>, vector<8x128xf32>
    tpu.vector_store %arg6[%c0_11, %c0_12], %12 {strides = array<i32>} : memref<8x128xf32, #tpu.memory_space<vmem>>, vector<8x128xf32>,
    return
  }
  func.func @transform_0(%arg0: i32) -> (i32, i32) {
    %c0_i32 = arith.constant 0 : i32
    %c0_i32_0 = arith.constant 0 : i32
    return %arg0, %c0_i32 : i32, i32
  }
  func.func @transform_1(%arg0: i32) -> (i32, i32) {
    %c0_i32 = arith.constant 0 : i32
    %c0_i32_0 = arith.constant 0 : i32
    %c0_i32_1 = arith.constant 0 : i32
    return %c0_i32, %c0_i32_0 : i32, i32
  }
  func.func @transform_2(%arg0: i32) -> (i32, i32) {
    %c0_i32 = arith.constant 0 : i32
    %c0_i32_0 = arith.constant 0 : i32
    %c0_i32_1 = arith.constant 0 : i32
    return %c0_i32, %c0_i32_0 : i32, i32
  }
  func.func @transform_3(%arg0: i32) -> (i32, i32) {
    %c0_i32 = arith.constant 0 : i32
    %c0_i32_0 = arith.constant 0 : i32
    %c0_i32_1 = arith.constant 0 : i32
    return %c0_i32, %c0_i32_0 : i32, i32
  }
  func.func @transform_4(%arg0: i32) -> (i32, i32) {
    %c0_i32 = arith.constant 0 : i32
    %c0_i32_0 = arith.constant 0 : i32
    %c0_i32_1 = arith.constant 0 : i32
    return %c0_i32, %c0_i32_0 : i32, i32
  }
  func.func @transform_5(%arg0: i32) -> (i32, i32) {
    %c0_i32 = arith.constant 0 : i32
    %c0_i32_0 = arith.constant 0 : i32
    return %c0_i32, %arg0 : i32, i32
  }
}

</mosaic_0001>

<bundles_post_ra>
// kernel: linear_vnet_forward.1
= control target key start
LH: loop header
LB: loop body
LE: loop exit
PB: predicated region body
PF: predicated region fallthrough
CT: control target
= control target key end

     0   :  { %vm64_vm0 = vcmask 130048   ;;  %v455_v3 = vmov 0   ;;  %v456_v35 = vmov 0.0|0.0   ;;  %vm457_vm2 = vmmov 0   ;;  %s612_s0 = inlined_call_operand.vmem [shape: f32[8,16], index: 0, kind: input, shape index: {}]   ;;  %s613_s1 = inlined_call_operand.vmem [shape: f32[32,16], index: 1, kind: input, shape index: {}]   ;;  %s614_s2 = inlined_call_operand.vmem [shape: f32[32,1], index: 2, kind: input, shape index: {}]   ;;  %s615_s4 = inlined_call_operand.vmem [shape: f32[8,1], index: 4, kind: input, shape index: {}]   ;;  %s616_s3 = inlined_call_operand.vmem [shape: f32[8,32], index: 3, kind: input, shape index: {}]   ;;  %s617_s5 = inlined_call_operand.vmem [shape: f32[8,8], index: 5, kind: output, shape index: {}]  }
   0x1   :  { %v24_v0 = vld [vmem:[%s612_s0] sm:$0xff]  ;;  %v25_v1 = vld [vmem:[%s612_s0 + $0x8] sm:$0xff]  ;;  %vm497_vm1 = vmpackc.low %vm64_vm0, %vm64_vm0  ;;  %453 = vset.pattern.permute.xlu0 %v455_v3  ;;  %454 = vset.pattern.permute.xlu1 %v455_v3  ;;  %v458_v36 = vmov 0.0   ;;  %vm221_vm3 = vcmask 261120  }
   0x2   :  { %v395_v4 = vpack.c.bf16 %v25_v1, %v24_v0  ;;  %v26_v5 = vld [vmem:[%s612_s0 + $0x10] sm:$0xff]  ;;  %v27_v6 = vld [vmem:[%s612_s0 + $0x18] sm:$0xff]  ;;  %v20_v8 = vld [vmem:[%s613_s1] sm:$0xff]  ;;  %443 = vmatprep.subr.bf16.mxu1 %v456_v35  ;;  %392 = vmatprep.mubr.msk.f32.mxu1 %vm457_vm2, %v458_v36 }
   0x3   :  { %v401_v7 = vpack.c.bf16 %v27_v6, %v26_v5  ;;  %v28_v9 = vld [vmem:[%s612_s0 + $0x20] sm:$0xff]  ;;  %v29_v10 = vld [vmem:[%s612_s0 + $0x28] sm:$0xff]  ;;  %378 = vmatprep.mubr.msk.f32.mxu0 %vm64_vm0, %v20_v8  ;;  %v42_v12 = vld [vmem:[%s614_s2 + $0x10] sm:$0xff] }
   0x4   :  { %397 = vmatprep.subr.msk.bf16.mxu0 %vm497_vm1, %v395_v4  ;;  %v40_v11 = vld [vmem:[%s614_s2] sm:$0xff]  ;;  %56 = vperm.xlu1 %454, %v42_v12   ;;  %v407_v13 = vpack.c.bf16 %v29_v10, %v28_v9  ;;  %v41_v14 = vld [vmem:[%s614_s2 + $0x8] sm:$0xff]  ;;  %v43_v15 = vld [vmem:[%s614_s2 + $0x18] sm:$0xff] }
   0x5   :  { %400 = vmatpush3.bf16.xpose.msk.msra.mxu0 %vm497_vm1, %v395_v4  ;;  %46 = vperm.xlu0 %453, %v40_v11   ;;  %v215_v16 = vld [vmem:[%s615_s4] sm:$0xff]  ;;  %v30_v17 = vld [vmem:[%s612_s0 + $0x30] sm:$0xff]  ;;  %v31_v18 = vld [vmem:[%s612_s0 + $0x38] sm:$0xff] }
   0x6   :  { %403 = vmatprep.subr.msk.bf16.mxu0 %vm497_vm1, %v401_v7  ;;  %v413_v19 = vpack.c.bf16 %v31_v18, %v30_v17  ;;  %v32_v20 = vld [vmem:[%s612_s0 + $0x40] sm:$0xff]  ;;  %v33_v21 = vld [vmem:[%s612_s0 + $0x48] sm:$0xff]  ;;  %v34_v23 = vld [vmem:[%s612_s0 + $0x50] sm:$0xff] }
   0x7   :  { %v419_v22 = vpack.c.bf16 %v33_v21, %v32_v20  ;;  %v35_v24 = vld [vmem:[%s612_s0 + $0x58] sm:$0xff]  ;;  %v36_v26 = vld [vmem:[%s612_s0 + $0x60] sm:$0xff]  ;;  %v37_v27 = vld [vmem:[%s612_s0 + $0x68] sm:$0xff] }
   0x8   :  { %61 = vperm.xlu1 %454, %v43_v15   ;;  %v425_v25 = vpack.c.bf16 %v35_v24, %v34_v23  ;;  %v431_v28 = vpack.c.bf16 %v37_v27, %v36_v26  ;;  %v38_v29 = vld [vmem:[%s612_s0 + $0x70] sm:$0xff]  ;;  %v39_v30 = vld [vmem:[%s612_s0 + $0x78] sm:$0xff]  ;;  %v21_v32 = vld [vmem:[%s613_s1 + $0x8] sm:$0xff] }
   0x9   :  { %51 = vperm.xlu0 %453, %v41_v14   ;;  %v437_v31 = vpack.c.bf16 %v39_v30, %v38_v29  ;;  %v22_v33 = vld [vmem:[%s613_s1 + $0x10] sm:$0xff]  ;;  %v23_v34 = vld [vmem:[%s613_s1 + $0x18] sm:$0xff]  ;;  %v214_v55 = vld [vmem:[%s616_s3] sm:$0xff] }
   0xd   :  { %406 = vmatpush3.bf16.xpose.msk.msra.mxu0 %vm497_vm1, %v401_v7  ;;  %218 = vperm.xlu0 %453, %v215_v16  }
   0xe   :  { %409 = vmatprep.subr.msk.bf16.mxu0 %vm497_vm1, %v407_v13 }
  0x15   :  { %412 = vmatpush3.bf16.xpose.msk.msra.mxu0 %vm497_vm1, %v407_v13 }
  0x16   :  { %415 = vmatprep.subr.msk.bf16.mxu0 %vm497_vm1, %v413_v19 }
  0x1d   :  { %418 = vmatpush3.bf16.xpose.msk.msra.mxu0 %vm497_vm1, %v413_v19 }
  0x1e   :  { %421 = vmatprep.subr.msk.bf16.mxu0 %vm497_vm1, %v419_v22 }
  0x25   :  { %424 = vmatpush3.bf16.xpose.msk.msra.mxu0 %vm497_vm1, %v419_v22 }
  0x26   :  { %427 = vmatprep.subr.msk.bf16.mxu0 %vm497_vm1, %v425_v25 }
  0x2d   :  { %430 = vmatpush3.bf16.xpose.msk.msra.mxu0 %vm497_vm1, %v425_v25 }
  0x2e   :  { %433 = vmatprep.subr.msk.bf16.mxu0 %vm497_vm1, %v431_v28 }
  0x35   :  { %436 = vmatpush3.bf16.xpose.msk.msra.mxu0 %vm497_vm1, %v431_v28 }
  0x36   :  { %439 = vmatprep.subr.msk.bf16.mxu0 %vm497_vm1, %v437_v31 }
  0x3d   :  { %442 = vmatpush3.bf16.xpose.msk.msra.mxu0 %vm497_vm1, %v437_v31 }
  0x44   :  { %379 = vmatmul.mubr.msk.f32.vlgmr.msra.gmra.mrb[0].mxu0 %vm64_vm0, %v21_v32 }
  0x45   :  { %381 = vmatprep.mubr.msk.f32.mxu0 %vm64_vm0, %v22_v33 }
  0x48   :  { %382 = vmatmul.mubr.msk.f32.gmra.mrb[2].mxu0 %vm64_vm0, %v23_v34 }
  0x83   :  { %v57_v38 = vpop.permute.xlu1 %56 }
  0x84   :  { %v47_v37 = vpop.permute.xlu0 %46 }
  0x87   :  { %v62_v45 = vpop.permute.xlu1 %61 }
  0x88   :  { %v52_v39 = vpop.permute.xlu0 %51 }
  0x8c   :  { %v219_v56 = vpop.permute.xlu0 %218 }
 0x117   :  { %v380_v40 = vpop.f32.mrb[0].mxu0 }
 0x118   :  { %v197_v41 = vadd.f32 %v380_v40, %v52_v39  ;;  %v191_v42 = vpop.f32.mrb[1].mxu0 }
 0x119   :  { %v192_v43 = vadd.f32 %v191_v42, %v47_v37 }
 0x11a   :  { %v211_v44 = vmax.f32 %v197_v41, 0.0 }
 0x11b   :  { %v210_v46 = vmax.f32 %v192_v43, 0.0  ;;  %v383_v47 = vpop.f32.mrb[2].mxu0 }
 0x11c   :  { %v207_v48 = vadd.f32 %v383_v47, %v62_v45  ;;  %v201_v49 = vpop.f32.mrb[3].mxu0 }
 0x11d   :  { %v202_v50 = vadd.f32 %v201_v49, %v57_v38  ;;  %v444_v51 = vpack.c.bf16 %v211_v44, %v210_v46 }
 0x11e   :  { %v213_v52 = vmax.f32 %v207_v48, 0.0 }
 0x11f   :  { %v212_v53 = vmax.f32 %v202_v50, 0.0  ;;  %445 = vmatpush3.bf16.msra.mxu1 %v444_v51 }
 0x120   :  { %446 = vmatprep.subr.bf16.mxu1 %v456_v35 }
 0x121   :  { %v447_v54 = vpack.c.bf16 %v213_v52, %v212_v53 }
 0x123   :  { %448 = vmatpush3.bf16.msra.mxu1 %v447_v54 }
 0x126   :  { %393 = vmatmul.mubr.msk.f32.vlgmr.msra.gmra.mrb[0].mxu1 %vm221_vm3, %v214_v55 }
 0x1f9   :  { %v291_v57 = vpop.f32.mrb[0].mxu1 }
 0x1fa   :  { %v292_v58 = vadd.f32 %v291_v57, %v219_v56  ;;  %v394_v59 = vpop.f32.mrb[1].mxu1 }
 0x1fc   :  { %295 = vst [vmem:[%s617_s5] sm:$0xff] %v292_v58 }

</bundles_post_ra>
